<compile_context>
chip_gen: v7x
topology: tpu7x:2x2x1
jax: 0.10.0
libtpu: 0.0.40
codegen_flags: <defaults>
</compile_context>

<pallas_src>
import math
from functools import partial

import jax
import jax.numpy as jnp
from jax import lax
from jax.experimental import pallas as pl
from jax.experimental.pallas import tpu as pltpu


def _lora_linear_kernel(x_ref, w_ref, b_ref, a_ref, l_ref, o_ref,
                        acc_ref, u_ref, *, scaling):
    """One (i, j, k) grid step.

    x_ref : (tm, tk)  input tile                      index (i, k)
    w_ref : (tn, tk)  frozen weight tile, (out, in)   index (j, k)
    b_ref : (1,  tn)  bias tile                       index (0, j)
    a_ref : (r,  tk)  lora_right tile, (r, in)        index (0, k)
    l_ref : (tn, r)   lora_left tile,  (out, r)       index (j, 0)
    o_ref : (tm, tn)  output tile                     index (i, j)
    acc_ref: (tm, tn) f32 accumulator  (scratch)
    u_ref  : (tm, r)  f32 LoRA down-projection accumulator (scratch)
    """
    k = pl.program_id(2)

    @pl.when(k == 0)
    def _():
        acc_ref[...] = jnp.zeros_like(acc_ref)
        u_ref[...] = jnp.zeros_like(u_ref)

    x = x_ref[...]

    # Base path: x @ W.T — contract the in_features dim of both operands
    # (W kept in its native (out, in) layout; no wrapper-side transpose).
    acc_ref[...] += lax.dot_general(
        x, w_ref[...], (((1,), (1,)), ((), ())),
        preferred_element_type=jnp.float32)

    # LoRA down-projection: x @ A.T -> (tm, r); tiny, accumulated over k.
    u_ref[...] += lax.dot_general(
        x, a_ref[...], (((1,), (1,)), ((), ())),
        preferred_element_type=jnp.float32)

    @pl.when(k == pl.num_programs(2) - 1)
    def _():
        # Fold scaling into the small (tm, r) intermediate, then up-project
        # with B.T and finalize with the bias.
        u = u_ref[...] * scaling
        lora = lax.dot_general(
            u, l_ref[...].astype(jnp.float32), (((1,), (1,)), ((), ())),
            preferred_element_type=jnp.float32)
        out = acc_ref[...] + lora + b_ref[...].astype(jnp.float32)
        o_ref[...] = out.astype(o_ref.dtype)


def _pick_tile(dim, desired, align):
    """Largest tile <= desired that is a multiple of `align` and divides
    `dim`; falls back to the full dim (always legal for BlockSpec)."""
    if dim <= desired:
        return dim
    t = (desired // align) * align
    while t >= align:
        if dim % t == 0:
            return t
        t -= align
    return dim


def lora_linear_forward(x, weight, bias, lora_right, lora_left,
                        lora_scaling, lora_dim,
                        *, block_m=256, block_n=512, block_k=512):
    """x: (..., in_features); weight: (out, in); bias: (out,);
    lora_right: (lora_dim, in); lora_left: (out, lora_dim)."""
    out_features, in_features = weight.shape
    r = lora_right.shape[0]
    lead_shape = x.shape[:-1]
    m = math.prod(lead_shape) if lead_shape else 1

    x2d = x.reshape(m, in_features)

    # Row tile: multiple of 8 (f32 sublane); pad M up so tm divides it.
    tm = min(block_m, max(8, ((m + 7) // 8) * 8))
    mp = ((m + tm - 1) // tm) * tm
    if mp != m:
        x2d = jnp.pad(x2d, ((0, mp - m), (0, 0)))

    # Lane-aligned K/N tiles (multiple of 128, or the full dim).
    tk = _pick_tile(in_features, block_k, 128)
    tn = _pick_tile(out_features, block_n, 128)

    b2d = bias.reshape(1, out_features)
    scaling = float(lora_scaling) / float(lora_dim)

    grid = (mp // tm, out_features // tn, in_features // tk)
    kernel = partial(_lora_linear_kernel, scaling=scaling)

    out2d = pl.pallas_call(
        kernel,
        out_shape=jax.ShapeDtypeStruct((mp, out_features), x.dtype),
        grid_spec=pltpu.PrefetchScalarGridSpec(
            num_scalar_prefetch=0,
            grid=grid,
            in_specs=[
                pl.BlockSpec((tm, tk), lambda i, j, k: (i, k)),   # x
                pl.BlockSpec((tn, tk), lambda i, j, k: (j, k)),   # W (out,in)
                pl.BlockSpec((1, tn), lambda i, j, k: (0, j)),    # bias
                pl.BlockSpec((r, tk), lambda i, j, k: (0, k)),    # A (r,in)
                pl.BlockSpec((tn, r), lambda i, j, k: (j, 0)),    # B (out,r)
            ],
            out_specs=pl.BlockSpec((tm, tn), lambda i, j, k: (i, j)),
            scratch_shapes=[
                pltpu.VMEM((tm, tn), jnp.float32),  # base accumulator
                pltpu.VMEM((tm, r), jnp.float32),   # LoRA down-proj accumulator
            ],
        ),
        compiler_params=pltpu.CompilerParams(
            dimension_semantics=("parallel", "parallel", "arbitrary"),
            vmem_limit_bytes=32 * 1024 * 1024,
        ),
    )(x2d, weight, b2d, lora_right, lora_left)

    if mp != m:
        out2d = out2d[:m]
    return out2d.reshape(*lead_shape, out_features)


if __name__ == "__main__":
    # Small shapes consistent with the module's forward (a linear layer over
    # a batched sequence of hidden vectors).  Block sizes are chosen to
    # exercise a multi-step grid (2 N-tiles x 2 K-tiles) even at this size.
    batch, seq = 2, 8
    in_features, out_features = 256, 256
    lora_dim = 8
    lora_scaling = 2.0

    key = jax.random.PRNGKey(0)
    k_x, k_w, k_b, k_r, k_l = jax.random.split(key, 5)

    x = jax.random.normal(k_x, (batch, seq, in_features), dtype=jnp.float32)
    weight = jax.random.normal(
        k_w, (out_features, in_features), dtype=jnp.float32) * 0.05
    bias = jax.random.normal(k_b, (out_features,), dtype=jnp.float32) * 0.05

    # init_parameters(): kaiming_uniform_(lora_right, a=sqrt(5))
    #   -> U(-1/sqrt(fan_in), 1/sqrt(fan_in))
    bound = 1.0 / math.sqrt(in_features)
    lora_right = jax.random.uniform(
        k_r, (lora_dim, in_features), dtype=jnp.float32,
        minval=-bound, maxval=bound)
    # init_parameters() zeros lora_left; use a nonzero (post-training-like)
    # value here so the LoRA path is actually exercised numerically.
    lora_left = jax.random.normal(
        k_l, (out_features, lora_dim), dtype=jnp.float32) * 0.1

    out = lora_linear_forward(
        x, weight, bias, lora_right, lora_left, lora_scaling, lora_dim,
        block_m=128, block_n=128, block_k=128)
    out = jax.block_until_ready(out)

    # Pure-JAX reference.
    scaling = lora_scaling / lora_dim
    ref = x @ weight.T + bias
    ref = ref + scaling * ((x @ lora_right.T) @ lora_left.T)

    assert out.shape == (batch, seq, out_features)
    assert jnp.allclose(out, ref, atol=1e-4, rtol=1e-4), "mismatch vs reference"

    print("KERNEL_OK")
</pallas_src>

<mosaic_0001>
module attributes {stable_mosaic.version = 11 : i64} {
  func.func @_lora_linear_kernel(%arg0: i32, %arg1: i32, %arg2: i32, %arg3: memref<16x128xf32, #tpu.memory_space<vmem>>, %arg4: memref<128x128xf32, #tpu.memory_space<vmem>>, %arg5: memref<1x128xf32, #tpu.memory_space<vmem>>, %arg6: memref<8x128xf32, #tpu.memory_space<vmem>>, %arg7: memref<128x8xf32, #tpu.memory_space<vmem>>, %arg8: memref<16x128xf32, #tpu.memory_space<vmem>>, %arg9: memref<16x128xf32, #tpu.memory_space<vmem>>, %arg10: memref<16x8xf32, #tpu.memory_space<vmem>>) attributes {dimension_semantics = [#tpu.dimension_semantics<parallel>, #tpu.dimension_semantics<parallel>, #tpu.dimension_semantics<arbitrary>], iteration_bounds = array<i64: 1, 2, 2>, scalar_prefetch = 0 : i64, scratch_operands = 2 : i64, tpu.core_type = #tpu.core_type<tc>, window_params = [{transform_indices = @transform_0, window_bounds = array<i64: 16, 128>}, {transform_indices = @transform_1, window_bounds = array<i64: 128, 128>}, {transform_indices = @transform_2, window_bounds = array<i64: 1, 128>}, {transform_indices = @transform_3, window_bounds = array<i64: 8, 128>}, {transform_indices = @transform_4, window_bounds = array<i64: 128, 8>}, {transform_indices = @transform_5, window_bounds = array<i64: 16, 128>}]} {
    %c0_i32 = arith.constant 0 : i32
    %0 = arith.cmpi eq, %arg2, %c0_i32 : i32
    %1 = arith.extui %0 : i1 to i32
    %c0_i32_0 = arith.constant 0 : i32
    %2 = arith.cmpi ne, %1, %c0_i32_0 : i32
    scf.if %2 {
      %cst_16 = arith.constant 0.000000e+00 : f32
      %17 = vector.broadcast %cst_16 : f32 to vector<16x128xf32>
      %c0_17 = arith.constant 0 : index
      %c0_18 = arith.constant 0 : index
      %18 = vector.load %arg9[%c0_17, %c0_18] : memref<16x128xf32, #tpu.memory_space<vmem>>, vector<16x128xf32>
      tpu.vector_store %arg9[%c0_17, %c0_18], %17 {strides = array<i32>} : memref<16x128xf32, #tpu.memory_space<vmem>>, vector<16x128xf32>,
      %cst_19 = arith.constant 0.000000e+00 : f32
      %19 = vector.broadcast %cst_19 : f32 to vector<16x8xf32>
      %c0_20 = arith.constant 0 : index
      %c0_21 = arith.constant 0 : index
      %20 = vector.load %arg10[%c0_20, %c0_21] : memref<16x8xf32, #tpu.memory_space<vmem>>, vector<16x8xf32>
      tpu.vector_store %arg10[%c0_20, %c0_21], %19 {strides = array<i32>} : memref<16x8xf32, #tpu.memory_space<vmem>>, vector<16x8xf32>,
    } else {
    }
    %c0 = arith.constant 0 : index
    %c0_1 = arith.constant 0 : index
    %3 = vector.load %arg3[%c0, %c0_1] : memref<16x128xf32, #tpu.memory_space<vmem>>, vector<16x128xf32>
    %c0_2 = arith.constant 0 : index
    %c0_3 = arith.constant 0 : index
    %4 = vector.load %arg9[%c0_2, %c0_3] : memref<16x128xf32, #tpu.memory_space<vmem>>, vector<16x128xf32>
    %c0_4 = arith.constant 0 : index
    %c0_5 = arith.constant 0 : index
    %5 = vector.load %arg4[%c0_4, %c0_5] : memref<128x128xf32, #tpu.memory_space<vmem>>, vector<128x128xf32>
    %cst = arith.constant dense<0.000000e+00> : vector<16x128xf32>
    %6 = tpu.matmul %3, %5, %cst {dimension_numbers = #tpu.dot_dimension_numbers<[1], [1], [0], [0], [0, 0, 1, 0], [], []>} : vector<16x128xf32>, vector<128x128xf32>, vector<16x128xf32> -> vector<16x128xf32>
    %7 = arith.addf %4, %6 : vector<16x128xf32>
    %c0_6 = arith.constant 0 : index
    %c0_7 = arith.constant 0 : index
    %8 = vector.load %arg9[%c0_6, %c0_7] : memref<16x128xf32, #tpu.memory_space<vmem>>, vector<16x128xf32>
    tpu.vector_store %arg9[%c0_6, %c0_7], %7 {strides = array<i32>} : memref<16x128xf32, #tpu.memory_space<vmem>>, vector<16x128xf32>,
    %c0_8 = arith.constant 0 : index
    %c0_9 = arith.constant 0 : index
    %9 = vector.load %arg10[%c0_8, %c0_9] : memref<16x8xf32, #tpu.memory_space<vmem>>, vector<16x8xf32>
    %c0_10 = arith.constant 0 : index
    %c0_11 = arith.constant 0 : index
    %10 = vector.load %arg6[%c0_10, %c0_11] : memref<8x128xf32, #tpu.memory_space<vmem>>, vector<8x128xf32>
    %cst_12 = arith.constant dense<0.000000e+00> : vector<16x8xf32>
    %11 = tpu.matmul %3, %10, %cst_12 {dimension_numbers = #tpu.dot_dimension_numbers<[1], [1], [0], [0], [0, 0, 1, 0], [], []>} : vector<16x128xf32>, vector<8x128xf32>, vector<16x8xf32> -> vector<16x8xf32>
    %12 = arith.addf %9, %11 : vector<16x8xf32>
    %c0_13 = arith.constant 0 : index
    %c0_14 = arith.constant 0 : index
    %13 = vector.load %arg10[%c0_13, %c0_14] : memref<16x8xf32, #tpu.memory_space<vmem>>, vector<16x8xf32>
    tpu.vector_store %arg10[%c0_13, %c0_14], %12 {strides = array<i32>} : memref<16x8xf32, #tpu.memory_space<vmem>>, vector<16x8xf32>,
    %c1_i32 = arith.constant 1 : i32
    %14 = arith.cmpi eq, %arg2, %c1_i32 : i32
    %15 = arith.extui %14 : i1 to i32
    %c0_i32_15 = arith.constant 0 : i32
    %16 = arith.cmpi ne, %15, %c0_i32_15 : i32
    scf.if %16 {
      %c0_16 = arith.constant 0 : index
      %c0_17 = arith.constant 0 : index
      %17 = vector.load %arg10[%c0_16, %c0_17] : memref<16x8xf32, #tpu.memory_space<vmem>>, vector<16x8xf32>
      %cst_18 = arith.constant 2.500000e-01 : f32
      %18 = vector.broadcast %cst_18 : f32 to vector<16x8xf32>
      %19 = arith.mulf %17, %18 : vector<16x8xf32>
      %c0_19 = arith.constant 0 : index
      %c0_20 = arith.constant 0 : index
      %20 = vector.load %arg7[%c0_19, %c0_20] : memref<128x8xf32, #tpu.memory_space<vmem>>, vector<128x8xf32>
      %cst_21 = arith.constant dense<0.000000e+00> : vector<16x128xf32>
      %21 = tpu.matmul %19, %20, %cst_21 {dimension_numbers = #tpu.dot_dimension_numbers<[1], [1], [0], [0], [0, 0, 1, 0], [], []>} : vector<16x8xf32>, vector<128x8xf32>, vector<16x128xf32> -> vector<16x128xf32>
      %c0_22 = arith.constant 0 : index
      %c0_23 = arith.constant 0 : index
      %22 = vector.load %arg9[%c0_22, %c0_23] : memref<16x128xf32, #tpu.memory_space<vmem>>, vector<16x128xf32>
      %23 = arith.addf %22, %21 : vector<16x128xf32>
      %c0_24 = arith.constant 0 : index
      %c0_25 = arith.constant 0 : index
      %24 = vector.load %arg5[%c0_24, %c0_25] : memref<1x128xf32, #tpu.memory_space<vmem>>, vector<1x128xf32>
      %25 = vector.broadcast %24 : vector<1x128xf32> to vector<16x128xf32>
      %26 = arith.addf %23, %25 : vector<16x128xf32>
      %c0_26 = arith.constant 0 : index
      %c0_27 = arith.constant 0 : index
      %27 = vector.load %arg8[%c0_26, %c0_27] : memref<16x128xf32, #tpu.memory_space<vmem>>, vector<16x128xf32>
      tpu.vector_store %arg8[%c0_26, %c0_27], %26 {strides = array<i32>} : memref<16x128xf32, #tpu.memory_space<vmem>>, vector<16x128xf32>,
    } else {
    }
    return
  }
  func.func @transform_0(%arg0: i32, %arg1: i32, %arg2: i32) -> (i32, i32) {
    %c0_i32 = arith.constant 0 : i32
    return %arg0, %arg2 : i32, i32
  }
  func.func @transform_1(%arg0: i32, %arg1: i32, %arg2: i32) -> (i32, i32) {
    %c0_i32 = arith.constant 0 : i32
    return %arg1, %arg2 : i32, i32
  }
  func.func @transform_2(%arg0: i32, %arg1: i32, %arg2: i32) -> (i32, i32) {
    %c0_i32 = arith.constant 0 : i32
    %c0_i32_0 = arith.constant 0 : i32
    return %c0_i32, %arg1 : i32, i32
  }
  func.func @transform_3(%arg0: i32, %arg1: i32, %arg2: i32) -> (i32, i32) {
    %c0_i32 = arith.constant 0 : i32
    %c0_i32_0 = arith.constant 0 : i32
    return %c0_i32, %arg2 : i32, i32
  }
  func.func @transform_4(%arg0: i32, %arg1: i32, %arg2: i32) -> (i32, i32) {
    %c0_i32 = arith.constant 0 : i32
    %c0_i32_0 = arith.constant 0 : i32
    return %arg1, %c0_i32 : i32, i32
  }
  func.func @transform_5(%arg0: i32, %arg1: i32, %arg2: i32) -> (i32, i32) {
    %c0_i32 = arith.constant 0 : i32
    return %arg0, %arg1 : i32, i32
  }
}

</mosaic_0001>

<bundles_post_ra>
// kernel: tpu_custom_call.1
= control target key start
LH: loop header
LB: loop body
LE: loop exit
PB: predicated region body
PF: predicated region fallthrough
CT: control target
= control target key end

     0   :  { %s1847_s0 = inlined_call_operand.vmem [shape: f32[16,256], index: 0, kind: input, shape index: {}]   ;;  %s1848_s1 = inlined_call_operand.hbm [shape: f32[256,256], index: 1, kind: input, shape index: {}]   ;;  %s1849_s2 = inlined_call_operand.vmem [shape: f32[1,256], index: 2, kind: input, shape index: {}]   ;;  %s1850_s3 = inlined_call_operand.vmem [shape: f32[8,256], index: 3, kind: input, shape index: {}]   ;;  %s1851_s4 = inlined_call_operand.vmem [shape: f32[256,8], index: 4, kind: input, shape index: {}]   ;;  %s1852_s5 = inlined_call_operand.hbm [shape: f32[16,256], index: 5, kind: output, shape index: {}]  }
   0x1   :  { %1862 = sst [smem:[#allocation20_spill]] %s1847_s0 }
   0x2   :  { %1863 = sst [smem:[#allocation21_spill]] %s1852_s5 }
   0x3   :  { %10 = vsyncpa [#allocation6], 0 }
   0x4   :  { %12 = vsyncpa [#allocation6 + $0x1], 0 }
   0x5   :  { %13 = vsyncpa [#allocation7], 0 }
   0x6   :  { %15 = vsyncpa [#allocation7 + $0x1], 0  ;;  %s1470_s18 = smov 0   ;;  %s1472_s19 = smov 0  }
   0x7   :  { %s1474_s20 = smov 0   ;;  %s1476_s21 = smov 0  }
   0x8   :  { %s1478_s22 = smov 0   ;;  %s1480_s23 = smov 0  }
   0x9   :  { %s1482_s24 = smov 0   ;;  %s1484_s25 = smov 0  }
   0xa   :  { %s1486_s26 = smov 0   ;;  %s1488_s27 = smov 0  }
   0xb   :  { %s1490_s28 = smov 0   ;;  %s1492_s29 = smov 0  }
   0xc   :  { %s1494_s30 = smov 0  }
   0xd LB: > { %1864 = sst [smem:[#allocation11_spill]] %s1381_s18  ;;  %s906_s6 = sadd.s32 4294967295, %s1429_s30   ;;  %s1429_s30 = sphi %s1494_s30, %s21_s30   ;;  %s1425_s29 = sphi %s1492_s29, %s1907_s29   ;;  %s1421_s28 = sphi %s1490_s28, %s1906_s28   ;;  %s1417_s27 = sphi %s1488_s27, %s1905_s27   ;;  %s1413_s26 = sphi %s1486_s26, %s1904_s26   ;;  %s1409_s25 = sphi %s1484_s25, %s1895_s25   ;;  %s1405_s24 = sphi %s1482_s24, %s1894_s24   ;;  %s1401_s23 = sphi %s1480_s23, %s1903_s23   ;;  %s1397_s22 = sphi %s1478_s22, %s1902_s22   ;;  %s1393_s21 = sphi %s1476_s21, %s1901_s21   ;;  %s1389_s20 = sphi %s1474_s20, %s1892_s20   ;;  %s1385_s19 = sphi %s1472_s19, %s1900_s19   ;;  %s1381_s18 = sphi %s1470_s18, %s1899_s18  }
   0xe   : > { %1865 = sst [smem:[#allocation12_spill]] %s1389_s20  ;;  %s33_s8 = sadd.s32 1, %s1421_s28 }
   0xf   : > { %1866 = sst [smem:[#allocation13_spill]] %s1409_s25  ;;  %s36_s9 = sadd.s32 1, %s1425_s29 }
  0x10   : > { %p34_p0 = scmp.ge.s32.totalorder %s33_s8, 2  ;;  %s49_s10 = sadd.s32 1, %s1409_s25 }
  0x11   : > { %p56_p1 = scmp.ne.s32.totalorder %s1409_s25, %s1405_s24  ;;  %p57_p2 = scmp.eq.s32.totalorder %s1429_s30, 0 }
  0x12   : > { %s1909_s8 = smov (%p34_p0, %s33_s8), 0  ;;  %s1911_s9 = smov (!%p34_p0, %s36_s9), %s1425_s29 }
  0x13   : > { %1867 = sst [smem:[#allocation14_spill]] %s1909_s8  ;;  %s45_s11 = ssub.s32 %s1421_s28, %s1909_s8 }
  0x14   : > { %p1548_p3 = por %p57_p2, %p56_p1  ;;  %p38_p4 = scmp.ge.s32.totalorder %s1911_s9, 2 }
  0x15   : > { %p47_p5 = scmp.eq.s32.totalorder %s45_s11, 0  ;;  %s77_s13 = sadd.s32 1, %s1401_s23 }
  0x16   : > { %p84_p6 = scmp.ne.s32.totalorder %s1401_s23, %s1397_s22  ;;  %s1913_s9 = smov (%p38_p4, %s1911_s9), 0 }
  0x17   : > { %1869 = sst [smem:[#allocation15_spill]] %s1913_s9  ;;  %s72_s15 = ssub.s32 %s1425_s29, %s1913_s9 }
  0x18   : > { %s1558_s14 = scalar_select %p47_p5, %s1409_s25, %s49_s10  }
  0x19   : > { %p1562_p7 = por %p84_p6, %p57_p2  ;;  %s74_s17 = sor.u32 %s72_s15, %s45_s11 }
  0x1a   : > { %1870 = sst [smem:[#allocation16_spill]] %s1558_s14  ;;  %p90_p8 = scmp.ne.s32.totalorder %s1397_s22, %s1393_s21 }
  0x1b   : > { %p75_p9 = scmp.eq.s32.totalorder %s74_s17, 0  ;;  %p91_p10 = scmp.eq.s32.totalorder %s906_s6, 0 }
  0x1c   : > { %p181_p11 = scmp.eq.s32.totalorder %s72_s15, 0  ;;  %s183_s7 = sadd.s32 1, %s1389_s20 }
  0x1d   : > { %s1572_s8 = scalar_select %p75_p9, %s1401_s23, %s77_s13  }
  0x1e   : > { %p1574_p12 = por %p91_p10, %p90_p8  ;;  %p193_p13 = scmp.ne.s32.totalorder %s1389_s20, %s1385_s19 }
  0x1f   : > { %1872 = sst [smem:[#allocation17_spill]] %s1572_s8  ;;  %p194_p0 = scmp.eq.s32.totalorder %s906_s6, 3 }
  0x20   : > { %s1581_s10 = scalar_select %p181_p11, %s1389_s20, %s183_s7  }
  0x21   : > { %p199_p1 = scmp.ne.s32.totalorder %s1385_s19, %s1381_s18  ;;  %s1875_s9 = sadd.s32 4294967294, %s1429_s30  }
  0x22   : > { %1874 = sst [smem:[#allocation18_spill]] %s1581_s10  ;;  %p200_p2 = scmp.eq.s32.totalorder %s1875_s9, 3 }
  0x23   : > { %p1589_p4 = por %p194_p0, %p193_p13  ;;  %p909_p6 = scmp.ge.s32.totalorder %s1429_s30, 4 }
  0x24   : > { %p1593_p5 = por %p200_p2, %p199_p1 }
  0x25   : > { %s1876_s21 = scalar_select %p1589_p4, 1, 0 }
  0x26   : > { %s1877_s11 = scalar_select %p1593_p5, 1, 0 }
  0x27   : > { %216 = sbr.rel (%p909_p6) target bundleno = 85 (0x55), region = 16 }
  0x28   : > { %1878 = sst [smem:[#allocation19_spill]] %s1877_s11 }
  0x2e   : > { %219 = sbr.rel (!%p1548_p3) target bundleno = 57 (0x39), region = 20  ;;  %s221_s6 = sand.u32 (%p1548_p3), 1, %s1409_s25  }
  0x2f   : > { %s911_s7 = sshll.u32 (%p1548_p3), %s1421_s28, 3  ;;  %s910_s13 = sshll.u32 (%p1548_p3), %s221_s6, 4 }
  0x30   : > { %s1879_s0 = sld [smem:[#allocation20_spill]] (%p1548_p3)  ;;  %s223_s14 = scalar_lea.vmem (%p1548_p3), [#allocation4], %s910_s13 }
  0x36   : > { %s228_s17 = scalar_lea.vmem %s1879_s0, %s911_s7 }
  0x37   : > { %v258_v0 = vld [vmem:[%s228_s17] sm:$0xff]  ;;  %v260_v1 = vld [vmem:[%s228_s17 + $0x10] sm:$0xff] }
  0x38   : > { %259 = vst [vmem:[%s223_s14] sm:$0xff] %v258_v0  ;;  %261 = vst [vmem:[%s223_s14 + $0x8] sm:$0xff] %v260_v1 }
  0x39 PF: > { %s268_s12 = sand.u32 1, %s1401_s23   ;;  %s948_s8 = sshll.u32 %s1425_s29, 5 }
  0x3a   : > { %s912_s10 = sshll.u32 %s268_s12, 7  ;;  %s278_s25 = sadd.s32 %s1421_s28, %s948_s8 }
  0x3b   : > { %s915_s20 = sshll.u32 %s278_s25, 7  ;;  %s272_s6 = scalar_lea.vmem [#allocation5], %s912_s10 }
  0x3c   : > { %s281_s11 = sshll.u32 %s272_s6, 4  ;;  %s1611_s7 = scalar_lea.hbm %s1848_s1, %s915_s20  ;;  %s1613_s11 = int_to_ptr.vmem [resolvable:$true] %s281_s11 }
  0x3d   : > { %s1615_s14 = scalar_lea.sflag [#allocation6], %s268_s12  ;;  %s1263_s13 = scalar_lea.hbm %s1611_s7, 2048 }
  0x3e   : > { %p1264_p3 = scmp.ne.s32.totalorder %s1611_s7, %s1263_s13  ;;  %s1267_s10 = scalar_lea.hbm %s1848_s1, 8192 }
  0x3f   : > { %p1268_p10 = scmp.lt.u32.totalorder %s1611_s7, %s1848_s1  ;;  %p1269_p11 = scmp.lt.u32.totalorder %s1267_s10, %s1263_s13 }
  0x40   : > { %p1265_p8 = pnand %p1264_p3, %p1562_p7  ;;  %p1271_p0 = scmp.lt.u32.totalorder %s1263_s13, %s1611_s7 }
  0x41   : > { %p1270_p13 = por %p1269_p11, %p1268_p10 }
  0x42   : > { %p1266_p9 = pneg %p1265_p8 }
  0x43   : > { %p1272_p1 = por %p1271_p0, %p1270_p13 }
  0x45   : > { %p1273_p2 = pnand %p1272_p1, %p1266_p9 }
  0x47   : > { %1276 = shalt.err (!%p1273_p2)
}
  0x48   : > { %s1277_s15 = scalar_lea.vmem %s1613_s11, 2048  ;;  %s1431_s17 = smov [#allocation5]  }
  0x49   : > { %p1278_p6 = scmp.ne.s32.totalorder %s1613_s11, %s1277_s15  ;;  %s1281_s12 = sshll.u32 %s1431_s17, 4  ;;  %s1282_s12 = int_to_ptr.vmem [resolvable:$false] %s1281_s12 }
  0x4a   : > { %s1283_s6 = scalar_lea.vmem %s1282_s12, 4096  ;;  %p1284_p5 = scmp.lt.s32.totalorder %s1613_s11, %s1282_s12 }
  0x4b   : > { %p1279_p3 = pnand %p1278_p6, %p1562_p7  ;;  %p1285_p4 = scmp.lt.s32.totalorder %s1283_s6, %s1277_s15 }
  0x4d   : > { %p1280_p8 = pneg %p1279_p3  ;;  %p1286_p10 = por %p1285_p4, %p1284_p5 }
  0x4f   : > { %p1287_p11 = pnand %p1286_p10, %p1280_p8 }
  0x51   : > { %1290 = shalt.err (!%p1287_p11)
}
  0x52   : > { %s1432_s9 = smov 256   ;;  %s1433_s13 = smov 128  }
  0x53   : > { %s1434_s25 = smov 8  }
  0x54   : > { %1143 = dma.hbm_to_vmem [thread:$0]  (%p1562_p7), %s1611_s7, 2048, %s1613_s11, %s1615_s14, %s1432_s9, %s1433_s13, %s1434_s25  }
  0x55 PF: > { %p916_p9 = scmp.ge.s32.totalorder %s1429_s30, 1  ;;  %p311_p13 = scmp.lt.s32.totalorder %s1429_s30, 5 }
  0x57   : > { %p312_p0 = pnand %p916_p9, %p311_p13 }
  0x58   : > { %s318_s8 = sand.u32 (!%p312_p0), 1, %s1405_s24   ;;  %s324_s10 = sand.u32 (!%p312_p0), 1, %s1397_s22  }
  0x59   : > { %315 = sbr.rel (%p312_p0) target bundleno = 638 (0x27e), region = 74  ;;  %s1643_s18 = sshll.u32 (!%p312_p0), %s318_s8, 4 }
  0x5a   : > { %s918_s20 = sshll.u32 (!%p312_p0), %s324_s10, 7  ;;  %s325_s17 = scalar_lea.sflag (!%p312_p0), [#allocation6], %s324_s10 }
  0x5b   : > { %s1646_s16 = scalar_lea.vmem (!%p312_p0), [#allocation5], %s918_s20 }
  0x60   : > { %1372 = dma.done.wait (%p1574_p12), %s325_s17, 2048  }
  0x61   : > { %1374 = vsyncadd (%p1574_p12), %s325_s17, 4294965248  ;;  %s1861_s24 = sand.u32 1, %s1385_s19   ;;  %p373_p7 = scmp.lt.s32.totalorder %s1417_s27, 1 }
  0x62   : > { %s919_s11 = sshll.u32 %s1861_s24, 4  ;;  %p376_p4 = scmp.lt.s32.totalorder %s1413_s26, 1 }
  0x63   : > { %s921_s7 = sshll.u32 %s1417_s27, 4  ;;  %s1674_s0 = scalar_lea.vmem [#allocation8], %s919_s11 }
  0x64   : > { %s1659_s14 = scalar_select %p373_p7, %s1417_s27, 1 }
  0x65   : > { %s377_s12 = scalar_select %p376_p4, %s1413_s26, 1 }
  0x66   : > { %s375_s9 = scalar_lea.vmem %s1849_s2, %s1659_s14  ;;  %p381_p12 = scmp.lt.s32.totalorder %s921_s7, 31 }
  0x67   : > { %s920_s13 = sshll.u32 %s377_s12, 3  ;;  %p923_p5 = scmp.ne.s32.totalorder %s1413_s26, 0 }
  0x68   : > { %s379_s10 = scalar_lea.vmem %s1850_s3, %s920_s13  ;;  %s1915_s7 = smov (!%p381_p12, %s921_s7), 31  ;;  %vm393_vm0 = vcmask (!%p923_p5), 64512   ;;  %v1435_v2 = vmov (!%p923_p5), 0.0  }
  0x69   : > { %s922_s20 = sshll.u32 %s1915_s7, 3  ;;  %390 = sbr.rel (%p923_p5) target bundleno = 112 (0x70), region = 86  ;;  %391 = vst [vmem:[#allocation2] sm:$0xff] (!%p923_p5), %v1435_v2  ;;  %392 = vst [vmem:[#allocation2 + $0x8] sm:$0xff] (!%p923_p5), %v1435_v2 }
  0x6a   : > { %s1672_s15 = scalar_lea.vmem %s1851_s4, %s922_s20  ;;  %394 = vst.msk [vmem:[#allocation3] sm:$0xff] (!%p923_p5), %vm393_vm0, %v1435_v2  ;;  %395 = vst.msk [vmem:[#allocation3 + $0x8] sm:$0xff] (!%p923_p5), %vm393_vm0, %v1435_v2 }
  0x70 PF: > { %v400_v3 = vld [vmem:[%s1646_s16] sm:$0xff]  ;;  %v401_v4 = vld [vmem:[%s1646_s16 + $0x8] sm:$0xff]  ;;  %v402_v5 = vld [vmem:[%s1646_s16 + $0x10] sm:$0xff]  ;;  %s1880_s24 = scalar_lea.vmem [#allocation4], %s1643_s18  ;;  %vm575_vm1 = vcmask 64512   ;;  %p924_p1 = scmp.ne.s32.totalorder %s1413_s26, 1 }
  0x71   : > { %v1063_v6 = vpack.c.bf16 %v401_v4, %v400_v3  ;;  %v403_v7 = vld [vmem:[%s1646_s16 + $0x18] sm:$0xff]  ;;  %v497_v9 = vld [vmem:[%s379_s10] sm:$0xff]  ;;  %v405_v12 = vld [vmem:[%s1646_s16 + $0x28] sm:$0xff]  ;;  %s1881_s11 = smov %s1880_s24 }
  0x72   : > { %v1067_v8 = vpack.c.bf16 %v403_v7, %v402_v5  ;;  %v396_v10 = vld [vmem:[%s1880_s24] sm:$0xff]  ;;  %1023 = vmatprep.subr.mxu1 %v497_v9  ;;  %v397_v13 = vld [vmem:[%s1881_s11 + $0x8] sm:$0xff]  ;;  %v407_v16 = vld [vmem:[%s1646_s16 + $0x38] sm:$0xff] }
  0x73   : > { %1064 = vmatprep.subr.bf16.mxu0 %v1063_v6  ;;  %v404_v11 = vld [vmem:[%s1646_s16 + $0x20] sm:$0xff]  ;;  %1025 = vmatprep.mubr.f32.mxu1 %v396_v10  ;;  %v406_v15 = vld [vmem:[%s1646_s16 + $0x30] sm:$0xff]  ;;  %v409_v19 = vld [vmem:[%s1646_s16 + $0x48] sm:$0xff] }
  0x74   : > { %1066 = vmatpush3.bf16.xpose.msra.mxu0 %v1063_v6  ;;  %1024 = vmatpush3.xpose.msra.mxu1 %v497_v9  ;;  %v1071_v14 = vpack.c.bf16 %v405_v12, %v404_v11  ;;  %v1075_v17 = vpack.c.bf16 %v407_v16, %v406_v15  ;;  %v408_v18 = vld [vmem:[%s1646_s16 + $0x40] sm:$0xff]  ;;  %v410_v21 = vld [vmem:[%s1646_s16 + $0x50] sm:$0xff]  ;;  %v411_v22 = vld [vmem:[%s1646_s16 + $0x58] sm:$0xff] }
  0x75   : > { %1068 = vmatprep.subr.bf16.mxu0 %v1067_v8  ;;  %1020 = vmatprep.mubr.f32.mxu0 %v396_v10  ;;  %v1079_v20 = vpack.c.bf16 %v409_v19, %v408_v18  ;;  %v1083_v23 = vpack.c.bf16 %v411_v22, %v410_v21  ;;  %v412_v24 = vld [vmem:[%s1646_s16 + $0x60] sm:$0xff]  ;;  %v413_v25 = vld [vmem:[%s1646_s16 + $0x68] sm:$0xff]  ;;  %v414_v27 = vld [vmem:[%s1646_s16 + $0x70] sm:$0xff] }
  0x76   : > { %v1087_v26 = vpack.c.bf16 %v413_v25, %v412_v24  ;;  %v415_v28 = vld [vmem:[%s1646_s16 + $0x78] sm:$0xff]  ;;  %v495_v31 = vld [vmem:[#allocation3] sm:$0xff]  ;;  %v399_v36 = vld [vmem:[#allocation2 + $0x8] sm:$0xff] }
  0x77   : > { %1026 = vmatmul.mubr.f32.vlgmr.msra.gmra.mrb[0].mxu1 %v397_v13  ;;  %v1091_v29 = vpack.c.bf16 %v415_v28, %v414_v27  ;;  %v496_v30 = vld [vmem:[#allocation3 + $0x8] sm:$0xff]  ;;  %v398_v37 = vld [vmem:[#allocation2] sm:$0xff]  ;;  %v587_v43 = vld [vmem:[%s1672_s15 + $0x8] sm:$0xff] (!%p924_p1) }
  0x78   : > { %v586_v42 = vld [vmem:[%s1672_s15] sm:$0xff] (!%p924_p1)  ;;  %vm1704_vm2 = vmpackc.low (!%p924_p1), %vm575_vm1, %vm575_vm1  ;;  %v588_v46 = vld [vmem:[%s1672_s15 + $0x10] sm:$0xff] (!%p924_p1) }
  0x79   : > { %v1095_v45 = vpack.c.bf16 (!%p924_p1), %v587_v43, %v586_v42  ;;  %v589_v47 = vld [vmem:[%s1672_s15 + $0x18] sm:$0xff] (!%p924_p1)  ;;  %v590_v50 = vld [vmem:[%s1672_s15 + $0x20] sm:$0xff] (!%p924_p1)  ;;  %v591_v51 = vld [vmem:[%s1672_s15 + $0x28] sm:$0xff] (!%p924_p1) }
  0x7a   : > { %v1101_v48 = vpack.c.bf16 (!%p924_p1), %v589_v47, %v588_v46  ;;  %v1107_v53 = vpack.c.bf16 (!%p924_p1), %v591_v51, %v590_v50  ;;  %v592_v54 = vld [vmem:[%s1672_s15 + $0x30] sm:$0xff] (!%p924_p1)  ;;  %v593_v55 = vld [vmem:[%s1672_s15 + $0x38] sm:$0xff] (!%p924_p1)  ;;  %v594_v57 = vld [vmem:[%s1672_s15 + $0x40] sm:$0xff] (!%p924_p1) }
  0x7b   : > { %v1113_v56 = vpack.c.bf16 (!%p924_p1), %v593_v55, %v592_v54  ;;  %v595_v58 = vld [vmem:[%s1672_s15 + $0x48] sm:$0xff] (!%p924_p1)  ;;  %v596_v60 = vld [vmem:[%s1672_s15 + $0x50] sm:$0xff] (!%p924_p1)  ;;  %v597_v61 = vld [vmem:[%s1672_s15 + $0x58] sm:$0xff] (!%p924_p1) }
  0x7c   : > { %1070 = vmatpush3.bf16.xpose.msra.mxu0 %v1067_v8  ;;  %v1119_v59 = vpack.c.bf16 (!%p924_p1), %v595_v58, %v594_v57  ;;  %v1125_v62 = vpack.c.bf16 (!%p924_p1), %v597_v61, %v596_v60  ;;  %v598_v63 = vld [vmem:[%s1672_s15 + $0x60] sm:$0xff] (!%p924_p1)  ;;  %v599_v0 = vld [vmem:[%s1672_s15 + $0x68] sm:$0xff] (!%p924_p1)  ;;  %v600_v2 = vld [vmem:[%s1672_s15 + $0x70] sm:$0xff] (!%p924_p1) }
  0x7d   : > { %1072 = vmatprep.subr.bf16.mxu0 %v1071_v14  ;;  %v1131_v1 = vpack.c.bf16 (!%p924_p1), %v599_v0, %v598_v63  ;;  %v601_v3 = vld [vmem:[%s1672_s15 + $0x78] sm:$0xff] (!%p924_p1)  ;;  %v943_v10 = vld [vmem:[%s375_s9] ss:$0 sm:$0xff] (!%p924_p1) }
  0x7e   : > { %v1137_v4 = vpack.c.bf16 (!%p924_p1), %v601_v3, %v600_v2 }
  0x84   : > { %1074 = vmatpush3.bf16.xpose.msra.mxu0 %v1071_v14 }
  0x85   : > { %1076 = vmatprep.subr.bf16.mxu0 %v1075_v17 }
  0x8c   : > { %1078 = vmatpush3.bf16.xpose.msra.mxu0 %v1075_v17 }
  0x8d   : > { %1080 = vmatprep.subr.bf16.mxu0 %v1079_v20 }
  0x94   : > { %1082 = vmatpush3.bf16.xpose.msra.mxu0 %v1079_v20 }
  0x95   : > { %1084 = vmatprep.subr.bf16.mxu0 %v1083_v23 }
  0x9c   : > { %1086 = vmatpush3.bf16.xpose.msra.mxu0 %v1083_v23 }
  0x9d   : > { %1088 = vmatprep.subr.bf16.mxu0 %v1087_v26 }
  0xa4   : > { %1090 = vmatpush3.bf16.xpose.msra.mxu0 %v1087_v26 }
  0xa5   : > { %1092 = vmatprep.subr.bf16.mxu0 %v1091_v29 }
  0xac   : > { %1094 = vmatpush3.bf16.xpose.msra.mxu0 %v1091_v29 }
  0xad   : > { %1097 = vmatprep.subr.msk.bf16.mxu0 (!%p924_p1), %vm1704_vm2, %v1095_v45 }
  0xb3   : > { %1021 = vmatmul.mubr.f32.vlgmr.msra.gmra.mrb[0].mxu0 %v397_v13 }
  0xb4   : > { %1100 = vmatpush3.bf16.xpose.msk.msra.mxu0 (!%p924_p1), %vm1704_vm2, %v1095_v45 }
  0xb5   : > { %1103 = vmatprep.subr.msk.bf16.mxu0 (!%p924_p1), %vm1704_vm2, %v1101_v48 }
  0xbc   : > { %1106 = vmatpush3.bf16.xpose.msk.msra.mxu0 (!%p924_p1), %vm1704_vm2, %v1101_v48 }
  0xbd   : > { %1109 = vmatprep.subr.msk.bf16.mxu0 (!%p924_p1), %vm1704_vm2, %v1107_v53 }
  0xc4   : > { %1112 = vmatpush3.bf16.xpose.msk.msra.mxu0 (!%p924_p1), %vm1704_vm2, %v1107_v53 }
  0xc5   : > { %1115 = vmatprep.subr.msk.bf16.mxu0 (!%p924_p1), %vm1704_vm2, %v1113_v56 }
  0xcc   : > { %1118 = vmatpush3.bf16.xpose.msk.msra.mxu0 (!%p924_p1), %vm1704_vm2, %v1113_v56 }
  0xcd   : > { %1121 = vmatprep.subr.msk.bf16.mxu0 (!%p924_p1), %vm1704_vm2, %v1119_v59 }
  0xd4   : > { %1124 = vmatpush3.bf16.xpose.msk.msra.mxu0 (!%p924_p1), %vm1704_vm2, %v1119_v59 }
  0xd5   : > { %1127 = vmatprep.subr.msk.bf16.mxu0 (!%p924_p1), %vm1704_vm2, %v1125_v62 }
  0xdc   : > { %1130 = vmatpush3.bf16.xpose.msk.msra.mxu0 (!%p924_p1), %vm1704_vm2, %v1125_v62 }
  0xdd   : > { %1133 = vmatprep.subr.msk.bf16.mxu0 (!%p924_p1), %vm1704_vm2, %v1131_v1 }
  0xe4   : > { %1136 = vmatpush3.bf16.xpose.msk.msra.mxu0 (!%p924_p1), %vm1704_vm2, %v1131_v1 }
  0xe5   : > { %1139 = vmatprep.subr.msk.bf16.mxu0 (!%p924_p1), %vm1704_vm2, %v1137_v4 }
  0xec   : > { %1142 = vmatpush3.bf16.xpose.msk.msra.mxu0 (!%p924_p1), %vm1704_vm2, %v1137_v4 }
 0x14a   : > { %v1027_v32 = vpop.f32.mrb[0].mxu1 }
 0x14b   : > { %v574_v33 = vadd.f32 %v1027_v32, %v496_v30  ;;  %v564_v34 = vpop.f32.mrb[1].mxu1 }
 0x14c   : > { %v573_v35 = vadd.f32 %v564_v34, %v495_v31 }
 0x14d   : > { %577 = vst.msk [vmem:[#allocation3 + $0x8] sm:$0xff] %vm575_vm1, %v574_v33 }
 0x14e   : > { %576 = vst.msk [vmem:[#allocation3] sm:$0xff] %vm575_vm1, %v573_v35 }
 0x154   : > { %v583_v5 = vld [vmem:[#allocation3 + $0x8] sm:$0xff] (!%p924_p1) }
 0x155   : > { %v582_v49 = vld [vmem:[#allocation3] sm:$0xff] (!%p924_p1)  ;;  %v585_v6 = vmul.f32 (!%p924_p1), 0.25, %v583_v5 }
 0x156   : > { %v584_v52 = vmul.f32 (!%p924_p1), 0.25, %v582_v49 }
 0x158   : > { %1060 = vmatprep.mubr.msk.f32.mxu0 (!%p924_p1), %vm575_vm1, %v584_v52 }
 0x184   : > { %581 = sbr.rel (%p924_p1) target bundleno = 609 (0x261), region = 90 }
 0x186   : > { %v1022_v38 = vpop.f32.mrb[0].mxu0 }
 0x187   : > { %v492_v39 = vadd.f32 %v1022_v38, %v399_v36  ;;  %v482_v40 = vpop.f32.mrb[1].mxu0  ;;  %1061 = vmatmul.mubr.msk.f32.vlgmr.msra.gmra.mrb[0].mxu0 (!%p924_p1), %vm575_vm1, %v585_v6 }
 0x188   : > { %v491_v41 = vadd.f32 %v482_v40, %v398_v37 }
 0x189   : > { %494 = vst [vmem:[#allocation2 + $0x8] sm:$0xff] %v492_v39 }
 0x18a   : > { %493 = vst [vmem:[#allocation2] sm:$0xff] %v491_v41 }
 0x190   : > { %v732_v7 = vld [vmem:[#allocation2 + $0x8] sm:$0xff] }
 0x191   : > { %v731_v8 = vld [vmem:[#allocation2] sm:$0xff] }
 0x25a   : > { %v1062_v9 = vpop.f32.mrb[0].mxu0 }
 0x25b   : > { %v734_v11 = vadd.f32 %v1062_v9, %v732_v7  ;;  %v722_v12 = vpop.f32.mrb[1].mxu0 }
 0x25c   : > { %v733_v13 = vadd.f32 %v731_v8, %v722_v12 }
 0x25d   : > { %v743_v14 = vadd.f32 %v943_v10, %v734_v11 }
 0x25e   : > { %v742_v15 = vadd.f32 %v943_v10, %v733_v13 }
 0x25f   : > { %745 = vst [vmem:[%s1674_s0 + $0x8] sm:$0xff] %v743_v14 }
 0x260   : > { %744 = vst [vmem:[%s1674_s0] sm:$0xff] %v742_v15 }
 0x261 PF: > { %s945_s15 = sshll.u32 %s1417_s27, 7  ;;  %s1884_s12 = sld [smem:[#allocation21_spill]] }
 0x262   : > { %s762_s14 = sshll.u32 %s1674_s0, 4  ;;  %s1885_s5 = sand.u32 1, %s1385_s19   ;;  %s1770_s14 = int_to_ptr.vmem [resolvable:$true] %s762_s14 }
 0x263   : > { %s1774_s9 = scalar_lea.sflag [#allocation7], %s1885_s5  ;;  %s1291_s13 = scalar_lea.vmem %s1770_s14, 256 }
 0x264   : > { %p1292_p2 = scmp.ne.s32.totalorder %s1770_s14, %s1291_s13  ;;  %p1886_p6 = scmp.ne.s32.totalorder %s1876_s21, 0 }
 0x265   : > { %s1436_s27 = smov [#allocation8]  }
 0x266   : > { %p1293_p3 = pnand %p1292_p2, %p1886_p6  ;;  %s1295_s25 = sshll.u32 %s1436_s27, 4  ;;  %s1296_s25 = int_to_ptr.vmem [resolvable:$false] %s1295_s25 }
 0x267   : > { %s1767_s6 = scalar_lea.hbm %s1884_s12, %s945_s15  ;;  %s1297_s8 = scalar_lea.vmem %s1296_s25, 512 }
 0x268   : > { %p1294_p8 = pneg %p1293_p3  ;;  %p1298_p10 = scmp.lt.s32.totalorder %s1770_s14, %s1296_s25 }
 0x269   : > { %p1299_p11 = scmp.lt.s32.totalorder %s1297_s8, %s1291_s13 }
 0x26b   : > { %p1300_p9 = por %p1299_p11, %p1298_p10 }
 0x26d   : > { %p1301_p13 = pnand %p1300_p9, %p1294_p8 }
 0x26f   : > { %1304 = shalt.err (!%p1301_p13)
}
 0x270   : > { %s1305_s0 = scalar_lea.hbm %s1767_s6, 256  ;;  %s1309_s17 = scalar_lea.hbm %s1884_s12, 512 }
 0x271   : > { %p1306_p0 = scmp.ne.s32.totalorder %s1767_s6, %s1305_s0  ;;  %p1310_p12 = scmp.lt.u32.totalorder %s1767_s6, %s1884_s12 }
 0x272   : > { %p1311_p5 = scmp.lt.u32.totalorder %s1309_s17, %s1305_s0  ;;  %p1313_p2 = scmp.lt.u32.totalorder %s1305_s0, %s1767_s6 }
 0x273   : > { %p1307_p7 = pnand %p1306_p0, %p1886_p6 }
 0x274   : > { %p1312_p1 = por %p1311_p5, %p1310_p12 }
 0x275   : > { %p1308_p4 = pneg %p1307_p7 }
 0x276   : > { %p1314_p3 = por %p1313_p2, %p1312_p1 }
 0x278   : > { %p1315_p8 = pnand %p1314_p3, %p1308_p4 }
 0x27a   : > { %1318 = shalt.err (!%p1315_p8)
}
 0x27b   : > { %s1437_s26 = smov 128   ;;  %s1438_s18 = smov 256  }
 0x27c   : > { %s1439_s15 = smov 8  }
 0x27d   : > { %1145 = dma.vmem_to_hbm [thread:$0]  (%p1886_p6), %s1770_s14, 256, %s1767_s6, %s1774_s9, %s1437_s26, %s1438_s18, %s1439_s15  }
 0x27e PF: > { %s1887_s16 = sld [smem:[#allocation11_spill]]  ;;  %s1888_s7 = sld [smem:[#allocation19_spill]] }
 0x27f   : > { %p1151_p10 = scmp.ge.s32.totalorder %s1429_s30, 2 }
 0x284   : > { %s777_s5 = sand.u32 1, %s1887_s16   ;;  %p1889_p11 = scmp.ne.s32.totalorder %s1888_s7, 0 }
 0x285   : > { %s778_s13 = scalar_lea.sflag [#allocation7], %s777_s5 }
 0x286   : > { %p1148_p9 = pnand %p1151_p10, %p1889_p11 }
 0x288   : > { %1376 = dma.done.wait (!%p1148_p9), %s778_s13, 256  }
 0x289   : > { %1378 = vsyncadd (!%p1148_p9), %s778_s13, 4294967040  ;;  %s21_s30 = sadd.s32 1, %s1429_s30   ;;  %s1891_s21 = sld [smem:[#allocation12_spill]] }
 0x28a   : > { %p1803_p13 = scmp.ge.s32.totalorder %s21_s30, 6   ;;  %s1892_s20 = sld [smem:[#allocation18_spill]] }
 0x28b   : > { %s1893_s6 = sld [smem:[#allocation17_spill]]  ;;  %s1894_s24 = sld [smem:[#allocation13_spill]] }
 0x28c   : > { %s1895_s25 = sld [smem:[#allocation16_spill]]  ;;  %s1896_s14 = sld [smem:[#allocation14_spill]] }
 0x28d   : > { %s1897_s9 = sld [smem:[#allocation15_spill]]  ;;  %s1899_s18 = smov %s1385_s19 }
 0x28e   : > { %s1904_s26 = smov %s1421_s28  ;;  %s1905_s27 = smov %s1425_s29 }
 0x28f   : > { %s1900_s19 = smov %s1891_s21  ;;  %s1901_s21 = smov %s1397_s22 }
 0x290   : > { %s1902_s22 = smov %s1401_s23  ;;  %20 = sbr.rel (!%p1803_p13) target bundleno = 13 (0xd), region = 148 }
 0x291   : > { %s1903_s23 = smov %s1893_s6 }
 0x292   : > { %s1906_s28 = smov %s1896_s14 }
 0x293   : > { %s1907_s29 = smov %s1897_s9 }
 0x297   :  { %783 = vsyncpa [#allocation6], 1 }
 0x298   :  { %785 = vsyncpa [#allocation6 + $0x1], 1 }
 0x299   :  { %786 = vsyncpa [#allocation7], 1 }
 0x29a   :  { %788 = vsyncpa [#allocation7 + $0x1], 1 }

</bundles_post_ra>
